<compile_context>
chip_gen: v7x
topology: tpu7x:2x2x1
jax: 0.10.0
libtpu: 0.0.40
codegen_flags: <defaults>
</compile_context>

<pallas_src>
import jax
import jax.numpy as jnp
from jax.experimental import pallas as pl
from jax.experimental.pallas import tpu as pltpu


def sft_kernel(xf_ref, xs_ref, w0f_ref, w0s_ref, b0_ref, w1_ref, b1_ref,
               out_ref):
    C = out_ref.shape[0]                       # mid_channels (64)
    wt = w0f_ref.dtype                         # matmul operand dtype

    xf = xf_ref[...]                           # (C,   tp)  feas channels
    xs = xs_ref[...]                           # (C/2, tp)  side channels

    # conv0 for BOTH branches at once: rows 0:C = scale, rows C:2C = shift.
    h = (jnp.dot(w0f_ref[...], xf.astype(wt), preferred_element_type=jnp.float32)
         + jnp.dot(w0s_ref[...], xs.astype(wt), preferred_element_type=jnp.float32)
         + b0_ref[...])                        # (2C, tp) f32
    h = jnp.maximum(h, 0.1 * h)                # LeakyReLU(0.1), f32 epilogue

    # conv1 for BOTH branches via one block-diagonal (2C, 2C) matmul.
    ss = jnp.dot(w1_ref[...], h.astype(wt),
                 preferred_element_type=jnp.float32) + b1_ref[...]
    scale = ss[:C]                             # (C, tp)
    shift = ss[C:]                             # (C, tp)

    # Fused SFT modulation, f32 math, lane-dense store.
    out_ref[...] = (xf.astype(jnp.float32) * scale + shift).astype(out_ref.dtype)


def pack_params(p, C, w_dtype=jnp.float32):
    """Pack PyTorch-style (Cout, Cin) weights for the fused kernel."""
    # conv0: stack scale|shift on the output-channel axis, split feas/side cols
    w0 = jnp.concatenate([p["w0_scale"], p["w0_shift"]], axis=0)     # (2C, Cin)
    w0f = w0[:, :C].astype(w_dtype)                                  # (2C, C)
    w0s = w0[:, C:].astype(w_dtype)                                  # (2C, C//2)
    b0 = jnp.concatenate([p["b0_scale"], p["b0_shift"]],
                         axis=0).reshape(-1, 1).astype(jnp.float32)  # (2C, 1)
    # conv1: block-diagonal so one matmul produces [scale; shift]
    hid = p["w1_scale"].shape[1]
    w1 = jnp.zeros((2 * C, 2 * hid), jnp.float32)
    w1 = w1.at[:C, :hid].set(p["w1_scale"]).at[C:, hid:].set(p["w1_shift"])
    w1 = w1.astype(w_dtype)                                          # (2C, 2C)
    b1 = jnp.concatenate([p["b1_scale"], p["b1_shift"]],
                         axis=0).reshape(-1, 1).astype(jnp.float32)  # (2C, 1)
    return w0f, w0s, b0, w1, b1


def sft_layer(feas, side_feas, params, *, tp=4096, w_dtype=None, out_dtype=None):
    """SFTLayer forward (small_sft=False path).

    feas:      (N, C, H, W) with C = mid_channels = 64 (module hardcodes 64).
               May already be bf16 (activations are streamed as-is; no wrapper
               cast is performed).
    side_feas: (N, C // 2, H, W)
    tp:        pixel tile (lanes); rounded to a multiple of 128, capped at 8192.
    w_dtype:   None -> f32 weights; jnp.bfloat16 -> bf16 weights + bf16 matmul
               operands (cast inside the kernel; epilogue stays f32).
    out_dtype: None -> feas.dtype; set jnp.bfloat16 to halve output HBM bytes.
    """
    N, C, H, W = feas.shape
    Ch = side_feas.shape[1]
    assert C == 64 and Ch == C // 2, "SFTLayer requires mid_channels == 64"
    HW = H * W

    w_dtype = jnp.float32 if w_dtype is None else w_dtype
    out_dtype = feas.dtype if out_dtype is None else jnp.dtype(out_dtype)

    # Lane-dense pixel tile: multiple of 128; cap at 8192 so the working set
    # (~2.8 KB/pixel f32) stays well inside v7x's 64 MiB per-TC VMEM.
    tp_eff = max(128, min(int(tp), 8192, pl.cdiv(HW, 128) * 128))
    tp_eff -= tp_eff % 128
    pblocks = pl.cdiv(HW, tp_eff)
    # v7x has 2 TensorCores: make sure the "parallel" grid has >= 2 blocks.
    if N * pblocks < 2 and HW > 128:
        tp_eff = max(128, pl.cdiv(pl.cdiv(HW, 2), 128) * 128)
        pblocks = pl.cdiv(HW, tp_eff)

    # Free reshapes, NCHW kept.  No pad: Pallas masks the ragged edge block
    # (OOB reads are garbage but lane-local; OOB writes are dropped).
    xf = feas.reshape(N, C, HW)
    xs = side_feas.reshape(N, Ch, HW)

    w0f, w0s, b0, w1, b1 = pack_params(params, C, w_dtype)
    C2 = 2 * C                                 # 128

    grid = (N, pblocks)

    def row_spec(rows):                        # batch squeezed, pixels tiled
        return pl.BlockSpec((None, rows, tp_eff), lambda n, p: (n, 0, p))

    def full_spec(r, c):                       # whole weight resident in VMEM
        return pl.BlockSpec((r, c), lambda n, p: (0, 0))

    # VMEM working set: double-buffered I/O tiles + f32 h/ss temporaries
    # + double-buffered resident weights; pad 25% and clamp to [32, 48] MiB
    # (safe on all of v5e / v6e / v7x).
    in_b = feas.dtype.itemsize
    out_b = out_dtype.itemsize
    w_b = jnp.dtype(w_dtype).itemsize
    per_pixel = 2 * (C + Ch) * in_b + 2 * C * out_b + 2 * C2 * 4
    weight_bytes = 2 * ((C2 * (C + Ch) + C2 * C2) * w_b + 2 * C2 * 4)
    vmem_est = int(1.25 * (tp_eff * per_pixel + weight_bytes)) + (1 << 20)
    vmem_limit = int(min(max(vmem_est, 32 << 20), 48 << 20))

    # Advisory cost estimate (kernel is HBM-bound on every TPU generation).
    flops = int(2 * N * HW * (C2 * (C + Ch) + C2 * C2) + 4 * N * HW * C2)
    bytes_accessed = int(N * HW * (C + Ch) * in_b + N * HW * C * out_b
                         + (C2 * (C + Ch) + C2 * C2) * w_b + 2 * C2 * 4)

    out = pl.pallas_call(
        sft_kernel,
        out_shape=jax.ShapeDtypeStruct((N, C, HW), out_dtype),
        grid=grid,
        in_specs=[
            row_spec(C),            # feas   (C,   tp)
            row_spec(Ch),           # side   (C/2, tp)
            full_spec(C2, C),       # w0 feas-cols   (128, 64)
            full_spec(C2, Ch),      # w0 side-cols   (128, 32)
            full_spec(C2, 1),       # b0             (128, 1)
            full_spec(C2, C2),      # w1 block-diag  (128, 128)
            full_spec(C2, 1),       # b1             (128, 1)
        ],
        out_specs=row_spec(C),
        compiler_params=pltpu.CompilerParams(
            dimension_semantics=("parallel", "parallel"),
            vmem_limit_bytes=vmem_limit),
        cost_estimate=pl.CostEstimate(flops=flops, transcendentals=0,
                                      bytes_accessed=bytes_accessed),
    )(xf, xs, w0f, w0s, b0, w1, b1)

    return out.reshape(N, C, H, W)


def make_params(key, mid_channels=64):
    """Deterministic synthetic parameters in PyTorch conv orientation
    (Cout, Cin) with kaiming-like fan_in scaling and (Cout,) biases."""
    cin = mid_channels + mid_channels // 2
    ks = jax.random.split(key, 8)

    def w(k, fout, fin):
        return jax.random.normal(k, (fout, fin), jnp.float32) * jnp.sqrt(2.0 / fin)

    return {
        "w0_scale": w(ks[0], 64, cin),
        "b0_scale": jax.random.normal(ks[1], (64,), jnp.float32) * 0.01,
        "w1_scale": w(ks[2], mid_channels, 64),
        "b1_scale": jax.random.normal(ks[3], (mid_channels,), jnp.float32) * 0.01,
        "w0_shift": w(ks[4], 64, cin),
        "b0_shift": jax.random.normal(ks[5], (64,), jnp.float32) * 0.01,
        "w1_shift": w(ks[6], mid_channels, 64),
        "b1_shift": jax.random.normal(ks[7], (mid_channels,), jnp.float32) * 0.01,
    }


def _reference(feas, side_feas, p):
    """Pure-JAX reference (NCHW, matches the PyTorch forward)."""
    x = jnp.concatenate([feas, side_feas], axis=1)

    def conv1x1(inp, w, b):
        return jnp.einsum('oc,nchw->nohw', w, inp) + b[None, :, None, None]

    h_s = conv1x1(x, p["w0_scale"], p["b0_scale"])
    h_s = jnp.where(h_s >= 0, h_s, 0.1 * h_s)
    scale = conv1x1(h_s, p["w1_scale"], p["b1_scale"])

    h_t = conv1x1(x, p["w0_shift"], p["b0_shift"])
    h_t = jnp.where(h_t >= 0, h_t, 0.1 * h_t)
    shift = conv1x1(h_t, p["w1_shift"], p["b1_shift"])

    return feas * scale + shift


if __name__ == "__main__":
    # mid_channels must be 64: SFT_scale_conv0 hardcodes 64 out-channels and
    # SFT_scale_conv1 expects mid_channels in-channels.  Keep spatial small.
    mid_channels = 64
    N, H, W = 2, 16, 16

    key = jax.random.PRNGKey(0)
    k_f, k_s, k_p, k_f2, k_s2 = jax.random.split(key, 5)
    feas = jax.random.normal(k_f, (N, mid_channels, H, W), jnp.float32)
    side_feas = jax.random.normal(k_s, (N, mid_channels // 2, H, W), jnp.float32)
    params = make_params(k_p, mid_channels)

    ref = _reference(feas, side_feas, params)

    # 1) f32 path (works on v5e/v6e/v7x), strict check.
    out = jax.block_until_ready(sft_layer(feas, side_feas, params))
    assert out.shape == (N, mid_channels, H, W)
    assert jnp.allclose(out, ref, atol=1e-3, rtol=1e-3)

    # 2) Ragged spatial size (H*W not a multiple of 128) -> exercises the
    #    pad-free masked edge block.
    H2, W2 = 16, 12
    feas2 = jax.random.normal(k_f2, (N, mid_channels, H2, W2), jnp.float32)
    side2 = jax.random.normal(k_s2, (N, mid_channels // 2, H2, W2), jnp.float32)
    ref2 = _reference(feas2, side2, params)
    out2 = jax.block_until_ready(sft_layer(feas2, side2, params))
    assert out2.shape == (N, mid_channels, H2, W2)
    assert jnp.allclose(out2, ref2, atol=1e-3, rtol=1e-3)

    # 3) bf16 weight / matmul-operand path (v5e MXU headroom), loose check.
    out_w = jax.block_until_ready(
        sft_layer(feas, side_feas, params, w_dtype=jnp.bfloat16))
    rel_w = jnp.max(jnp.abs(out_w - ref)) / jnp.max(jnp.abs(ref))
    assert bool(jnp.isfinite(out_w).all()) and float(rel_w) < 5e-2

    # 4) bf16 output path (halves output HBM bytes for bf16-tolerant consumers).
    out_b = jax.block_until_ready(
        sft_layer(feas, side_feas, params, out_dtype=jnp.bfloat16))
    assert out_b.dtype == jnp.bfloat16
    rel_b = jnp.max(jnp.abs(out_b.astype(jnp.float32) - ref)) / jnp.max(jnp.abs(ref))
    assert bool(jnp.isfinite(out_b.astype(jnp.float32)).all()) and float(rel_b) < 5e-2

    print("KERNEL_OK")
</pallas_src>

<mosaic_0001>
module attributes {stable_mosaic.version = 11 : i64} {
  func.func @sft_kernel(%arg0: i32, %arg1: i32, %arg2: memref<1x64x256xf32, #tpu.memory_space<vmem>>, %arg3: memref<1x32x256xf32, #tpu.memory_space<vmem>>, %arg4: memref<128x64xf32, #tpu.memory_space<vmem>>, %arg5: memref<128x32xf32, #tpu.memory_space<vmem>>, %arg6: memref<128x1xf32, #tpu.memory_space<vmem>>, %arg7: memref<128x128xf32, #tpu.memory_space<vmem>>, %arg8: memref<128x1xf32, #tpu.memory_space<vmem>>, %arg9: memref<1x64x256xf32, #tpu.memory_space<vmem>>) attributes {dimension_semantics = [#tpu.dimension_semantics<parallel>, #tpu.dimension_semantics<parallel>], iteration_bounds = array<i64: 2, 1>, scalar_prefetch = 0 : i64, scratch_operands = 0 : i64, tpu.core_type = #tpu.core_type<tc>, window_params = [{transform_indices = @transform_0, window_bounds = array<i64: 1, 64, 256>}, {transform_indices = @transform_1, window_bounds = array<i64: 1, 32, 256>}, {pipeline_mode = #tpu.pipeline_mode<synchronous>, transform_indices = @transform_2, window_bounds = array<i64: 128, 64>}, {pipeline_mode = #tpu.pipeline_mode<synchronous>, transform_indices = @transform_3, window_bounds = array<i64: 128, 32>}, {pipeline_mode = #tpu.pipeline_mode<synchronous>, transform_indices = @transform_4, window_bounds = array<i64: 128, 1>}, {pipeline_mode = #tpu.pipeline_mode<synchronous>, transform_indices = @transform_5, window_bounds = array<i64: 128, 128>}, {pipeline_mode = #tpu.pipeline_mode<synchronous>, transform_indices = @transform_6, window_bounds = array<i64: 128, 1>}, {transform_indices = @transform_7, window_bounds = array<i64: 1, 64, 256>}]} {
    %c0 = arith.constant 0 : index
    %c0_0 = arith.constant 0 : index
    %c0_1 = arith.constant 0 : index
    %0 = vector.load %arg2[%c0, %c0_0, %c0_1] : memref<1x64x256xf32, #tpu.memory_space<vmem>>, vector<1x64x256xf32>
    %1 = vector.shape_cast %0 : vector<1x64x256xf32> to vector<64x256xf32>
    %c0_2 = arith.constant 0 : index
    %c0_3 = arith.constant 0 : index
    %c0_4 = arith.constant 0 : index
    %2 = vector.load %arg3[%c0_2, %c0_3, %c0_4] : memref<1x32x256xf32, #tpu.memory_space<vmem>>, vector<1x32x256xf32>
    %3 = vector.shape_cast %2 : vector<1x32x256xf32> to vector<32x256xf32>
    %c0_5 = arith.constant 0 : index
    %c0_6 = arith.constant 0 : index
    %4 = vector.load %arg4[%c0_5, %c0_6] : memref<128x64xf32, #tpu.memory_space<vmem>>, vector<128x64xf32>
    %cst = arith.constant dense<0.000000e+00> : vector<128x256xf32>
    %5 = tpu.matmul %4, %1, %cst {dimension_numbers = #tpu.dot_dimension_numbers<[1], [0], [0], [1], [0, 0, 1, 1], [], []>} : vector<128x64xf32>, vector<64x256xf32>, vector<128x256xf32> -> vector<128x256xf32>
    %c0_7 = arith.constant 0 : index
    %c0_8 = arith.constant 0 : index
    %6 = vector.load %arg5[%c0_7, %c0_8] : memref<128x32xf32, #tpu.memory_space<vmem>>, vector<128x32xf32>
    %cst_9 = arith.constant dense<0.000000e+00> : vector<128x256xf32>
    %7 = tpu.matmul %6, %3, %cst_9 {dimension_numbers = #tpu.dot_dimension_numbers<[1], [0], [0], [1], [0, 0, 1, 1], [], []>} : vector<128x32xf32>, vector<32x256xf32>, vector<128x256xf32> -> vector<128x256xf32>
    %8 = arith.addf %5, %7 : vector<128x256xf32>
    %c0_10 = arith.constant 0 : index
    %c0_11 = arith.constant 0 : index
    %9 = vector.load %arg6[%c0_10, %c0_11] : memref<128x1xf32, #tpu.memory_space<vmem>>, vector<128x1xf32>
    %10 = vector.broadcast %9 : vector<128x1xf32> to vector<128x256xf32>
    %11 = arith.addf %8, %10 : vector<128x256xf32>
    %cst_12 = arith.constant 1.000000e-01 : f32
    %12 = vector.broadcast %cst_12 : f32 to vector<128x256xf32>
    %13 = arith.mulf %12, %11 : vector<128x256xf32>
    %14 = arith.maximumf %11, %13 : vector<128x256xf32>
    %c0_13 = arith.constant 0 : index
    %c0_14 = arith.constant 0 : index
    %15 = vector.load %arg7[%c0_13, %c0_14] : memref<128x128xf32, #tpu.memory_space<vmem>>, vector<128x128xf32>
    %cst_15 = arith.constant dense<0.000000e+00> : vector<128x256xf32>
    %16 = tpu.matmul %15, %14, %cst_15 {dimension_numbers = #tpu.dot_dimension_numbers<[1], [0], [0], [1], [0, 0, 1, 1], [], []>} : vector<128x128xf32>, vector<128x256xf32>, vector<128x256xf32> -> vector<128x256xf32>
    %c0_16 = arith.constant 0 : index
    %c0_17 = arith.constant 0 : index
    %17 = vector.load %arg8[%c0_16, %c0_17] : memref<128x1xf32, #tpu.memory_space<vmem>>, vector<128x1xf32>
    %18 = vector.broadcast %17 : vector<128x1xf32> to vector<128x256xf32>
    %19 = arith.addf %16, %18 : vector<128x256xf32>
    %20 = vector.extract_strided_slice %19 {offsets = [0, 0], sizes = [64, 256], strides = [1, 1]} : vector<128x256xf32> to vector<64x256xf32>
    %21 = vector.extract_strided_slice %19 {offsets = [64, 0], sizes = [64, 256], strides = [1, 1]} : vector<128x256xf32> to vector<64x256xf32>
    %22 = arith.mulf %1, %20 : vector<64x256xf32>
    %23 = arith.addf %22, %21 : vector<64x256xf32>
    %c0_18 = arith.constant 0 : index
    %c0_19 = arith.constant 0 : index
    %c0_20 = arith.constant 0 : index
    %24 = vector.load %arg9[%c0_18, %c0_19, %c0_20] : memref<1x64x256xf32, #tpu.memory_space<vmem>>, vector<1x64x256xf32>
    %25 = vector.shape_cast %24 : vector<1x64x256xf32> to vector<64x256xf32>
    %26 = vector.shape_cast %23 : vector<64x256xf32> to vector<1x64x256xf32>
    tpu.vector_store %arg9[%c0_18, %c0_19, %c0_20], %26 {strides = array<i32>} : memref<1x64x256xf32, #tpu.memory_space<vmem>>, vector<1x64x256xf32>,
    return
  }
  func.func @transform_0(%arg0: i32, %arg1: i32) -> (i32, i32, i32) {
    %c0_i32 = arith.constant 0 : i32
    %c0_i32_0 = arith.constant 0 : i32
    return %arg0, %c0_i32, %arg1 : i32, i32, i32
  }
  func.func @transform_1(%arg0: i32, %arg1: i32) -> (i32, i32, i32) {
    %c0_i32 = arith.constant 0 : i32
    %c0_i32_0 = arith.constant 0 : i32
    return %arg0, %c0_i32, %arg1 : i32, i32, i32
  }
  func.func @transform_2(%arg0: i32, %arg1: i32) -> (i32, i32) {
    %c0_i32 = arith.constant 0 : i32
    %c0_i32_0 = arith.constant 0 : i32
    %c0_i32_1 = arith.constant 0 : i32
    return %c0_i32, %c0_i32_0 : i32, i32
  }
  func.func @transform_3(%arg0: i32, %arg1: i32) -> (i32, i32) {
    %c0_i32 = arith.constant 0 : i32
    %c0_i32_0 = arith.constant 0 : i32
    %c0_i32_1 = arith.constant 0 : i32
    return %c0_i32, %c0_i32_0 : i32, i32
  }
  func.func @transform_4(%arg0: i32, %arg1: i32) -> (i32, i32) {
    %c0_i32 = arith.constant 0 : i32
    %c0_i32_0 = arith.constant 0 : i32
    %c0_i32_1 = arith.constant 0 : i32
    return %c0_i32, %c0_i32_0 : i32, i32
  }
  func.func @transform_5(%arg0: i32, %arg1: i32) -> (i32, i32) {
    %c0_i32 = arith.constant 0 : i32
    %c0_i32_0 = arith.constant 0 : i32
    %c0_i32_1 = arith.constant 0 : i32
    return %c0_i32, %c0_i32_0 : i32, i32
  }
  func.func @transform_6(%arg0: i32, %arg1: i32) -> (i32, i32) {
    %c0_i32 = arith.constant 0 : i32
    %c0_i32_0 = arith.constant 0 : i32
    %c0_i32_1 = arith.constant 0 : i32
    return %c0_i32, %c0_i32_0 : i32, i32
  }
  func.func @transform_7(%arg0: i32, %arg1: i32) -> (i32, i32, i32) {
    %c0_i32 = arith.constant 0 : i32
    %c0_i32_0 = arith.constant 0 : i32
    return %arg0, %c0_i32, %arg1 : i32, i32, i32
  }
}

</mosaic_0001>

<bundles_post_ra>
// kernel: tpu_custom_call.1
= control target key start
LH: loop header
LB: loop body
LE: loop exit
PB: predicated region body
PF: predicated region fallthrough
CT: control target
= control target key end

     0   :  { %12 = vsyncpa [#allocation3], 0  ;;  %s2384_s0 = inlined_call_operand.vmem [shape: f32[2,64,256], index: 0, kind: input, shape index: {}]   ;;  %s2385_s1 = inlined_call_operand.vmem [shape: f32[2,32,256], index: 1, kind: input, shape index: {}]   ;;  %s2386_s2 = inlined_call_operand.vmem [shape: f32[128,64], index: 2, kind: input, shape index: {}]   ;;  %s2387_s3 = inlined_call_operand.vmem [shape: f32[128,32], index: 3, kind: input, shape index: {}]   ;;  %s2388_s4 = inlined_call_operand.vmem [shape: f32[128,1], index: 4, kind: input, shape index: {}]   ;;  %s2389_s5 = inlined_call_operand.vmem [shape: f32[128,128], index: 5, kind: input, shape index: {}]   ;;  %s2390_s6 = inlined_call_operand.vmem [shape: f32[128,1], index: 6, kind: input, shape index: {}]   ;;  %s2391_s7 = inlined_call_operand.hbm [shape: f32[2,64,256], index: 7, kind: output, shape index: {}]  }
   0x1   :  { %14 = vsyncpa [#allocation3 + $0x1], 0  ;;  %s1781_s24 = smov 0   ;;  %s1783_s25 = smov 0  }
   0x2   :  { %s1785_s26 = smov 0   ;;  %s1787_s27 = smov 0  }
   0x3   :  { %s1789_s28 = smov 0   ;;  %s1791_s29 = smov 0  }
   0x4 LB: > { %s1446_s30 = sadd.s32 4294967295, %s1734_s29   ;;  %s1447_s8 = sadd.s32 4294967294, %s1734_s29   ;;  %s1734_s29 = sphi %s1791_s29, %s20_s29   ;;  %s1730_s28 = sphi %s1789_s28, %s2398_s28   ;;  %s1726_s27 = sphi %s1787_s27, %s2397_s27   ;;  %s1722_s26 = sphi %s1785_s26, %s2396_s26   ;;  %s1718_s25 = sphi %s1783_s25, %s2395_s25   ;;  %s1714_s24 = sphi %s1781_s24, %s2394_s24  }
   0x5   : > { %s32_s9 = sadd.s32 1, %s1730_s28  ;;  %s202_s10 = sadd.s32 1, %s1722_s26 }
   0x6   : > { %p34_p0 = scmp.ge.s32.totalorder %s32_s9, 2  ;;  %p212_p1 = scmp.ne.s32.totalorder %s1722_s26, %s1718_s25 }
   0x7   : > { %p213_p2 = scmp.eq.s32.totalorder %s1446_s30, 1  ;;  %p218_p3 = scmp.ne.s32.totalorder %s1718_s25, %s1714_s24 }
   0x8   : > { %s2400_s9 = smov (%p34_p0, %s32_s9), 0  ;;  %p219_p5 = scmp.eq.s32.totalorder %s1447_s8, 1 }
   0x9   : > { %p1821_p4 = por %p213_p2, %p212_p1  ;;  %s197_s12 = ssub.s32 %s1730_s28, %s2400_s9 }
   0xa   : > { %p1450_p6 = scmp.ge.s32.totalorder %s1734_s29, 1  ;;  %p200_p7 = scmp.eq.s32.totalorder %s197_s12, 0 }
   0xb   : > { %p1828_p8 = por %p219_p5, %p218_p3  ;;  %p278_p9 = scmp.lt.s32.totalorder %s1734_s29, 3 }
   0xc   : > { %s1834_s14 = scalar_select %p200_p7, %s1722_s26, %s202_s10  }
   0xd   : > { %p279_p10 = pnand %p1450_p6, %p278_p9 }
   0xe   : > { %p324_p11 = scmp.lt.s32.totalorder (!%p279_p10), %s1726_s27, 1  ;;  %v1736_v0 = vmov (!%p279_p10), 0.0   ;;  %v1737_v1 = vmov (!%p279_p10), 0   ;;  %v384_v21 = vld [vmem:[%s2387_s3] sm:$0xff] (!%p279_p10)  ;;  %vm400_vm0 = vcmask (!%p279_p10), 261120   ;;  %v385_v30 = vld [vmem:[%s2387_s3 + $0x8] sm:$0xff] (!%p279_p10) }
   0xf   : > { %282 = sbr.rel (%p279_p10) target bundleno = 648 (0x288), region = 48  ;;  %513 = vmatprep.mubr.f32.mxu0 (!%p279_p10), %v1736_v0  ;;  %561 = vmatprep.mubr.f32.mxu1 (!%p279_p10), %v1736_v0  ;;  %v392_v23 = vld [vmem:[%s2387_s3 + $0x40] sm:$0xff] (!%p279_p10)  ;;  %v393_v32 = vld [vmem:[%s2387_s3 + $0x48] sm:$0xff] (!%p279_p10)  ;;  %v822_v33 = vld [vmem:[%s2388_s4 + $0x10] sm:$0xff] (!%p279_p10)  ;;  %vm610_vm1 = vcmask (!%p279_p10), 523264   ;;  %s1495_s18 = sshll.u32 (!%p279_p10), %s1726_s27, 11 }
  0x10   : > { %1647 = vset.pattern.permute.xlu0 (!%p279_p10), %v1737_v1  ;;  %1648 = vset.pattern.permute.xlu1 (!%p279_p10), %v1737_v1  ;;  %v820_v29 = vld [vmem:[%s2388_s4] sm:$0xff] (!%p279_p10)  ;;  %v821_v39 = vld [vmem:[%s2388_s4 + $0x8] sm:$0xff] (!%p279_p10)  ;;  %v823_v40 = vld [vmem:[%s2388_s4 + $0x18] sm:$0xff] (!%p279_p10)  ;;  %s1738_s30 = smov (!%p279_p10), [#allocation2]  }
  0x11   : > { %838 = vperm.xlu0 (!%p279_p10), %1647, %v820_v29   ;;  %848 = vperm.xlu1 (!%p279_p10), %1648, %v822_v33   ;;  %v386_v41 = vld [vmem:[%s2387_s3 + $0x10] sm:$0xff] (!%p279_p10)  ;;  %v824_v47 = vld [vmem:[%s2388_s4 + $0x20] sm:$0xff] (!%p279_p10)  ;;  %v825_v48 = vld [vmem:[%s2388_s4 + $0x28] sm:$0xff] (!%p279_p10)  ;;  %s1660_s8 = sshll.u32 (!%p279_p10), %s1738_s30, 4  ;;  %s1661_s8 = int_to_ptr.vmem [resolvable:$false] %s1660_s8 }
  0x12   : > { %v394_v43 = vld [vmem:[%s2387_s3 + $0x50] sm:$0xff] (!%p279_p10)  ;;  %v387_v49 = vld [vmem:[%s2387_s3 + $0x18] sm:$0xff] (!%p279_p10)  ;;  %v388_v54 = vld [vmem:[%s2387_s3 + $0x20] sm:$0xff] (!%p279_p10)  ;;  %s1662_s10 = scalar_lea.vmem (!%p279_p10), %s1661_s8, 4096 }
  0x13   : > { %v395_v51 = vld [vmem:[%s2387_s3 + $0x58] sm:$0xff] (!%p279_p10)  ;;  %v826_v52 = vld [vmem:[%s2388_s4 + $0x30] sm:$0xff] (!%p279_p10)  ;;  %v396_v55 = vld [vmem:[%s2387_s3 + $0x60] sm:$0xff] (!%p279_p10) }
  0x14   : > { %v827_v53 = vld [vmem:[%s2388_s4 + $0x38] sm:$0xff] (!%p279_p10)  ;;  %v828_v56 = vld [vmem:[%s2388_s4 + $0x40] sm:$0xff] (!%p279_p10)  ;;  %v829_v57 = vld [vmem:[%s2388_s4 + $0x48] sm:$0xff] (!%p279_p10) }
  0x15   : > { %843 = vperm.xlu0 (!%p279_p10), %1647, %v821_v39   ;;  %853 = vperm.xlu1 (!%p279_p10), %1648, %v823_v40   ;;  %v389_v58 = vld [vmem:[%s2387_s3 + $0x28] sm:$0xff] (!%p279_p10)  ;;  %v830_v60 = vld [vmem:[%s2388_s4 + $0x50] sm:$0xff] (!%p279_p10)  ;;  %v831_v61 = vld [vmem:[%s2388_s4 + $0x58] sm:$0xff] (!%p279_p10) }
  0x16   : > { %s325_s15 = scalar_select %p324_p11, %s1726_s27, 1  ;;  %v397_v59 = vld [vmem:[%s2387_s3 + $0x68] sm:$0xff]  ;;  %v390_v62 = vld [vmem:[%s2387_s3 + $0x30] sm:$0xff]  ;;  %v832_v1 = vld [vmem:[%s2388_s4 + $0x60] sm:$0xff] }
  0x17   : > { %v398_v63 = vld [vmem:[%s2387_s3 + $0x70] sm:$0xff]  ;;  %v373_v29 = vld [vmem:[%s2386_s2 + $0x28] sm:$0xff]  ;;  %v1040_v33 = vld [vmem:[%s2390_s6 + $0x60] sm:$0xff] }
  0x18   : > { %s1493_s16 = sshll.u32 %s325_s15, 7  ;;  %s1494_s17 = sshll.u32 %s325_s15, 6  ;;  %v376_v39 = vld [vmem:[%s2386_s2 + $0x40] sm:$0xff]  ;;  %v377_v40 = vld [vmem:[%s2386_s2 + $0x48] sm:$0xff] }
  0x19   : > { %s1843_s20 = scalar_lea.vmem %s2384_s0, %s1493_s16  ;;  %s341_s23 = scalar_lea.vmem %s2385_s1, %s1494_s17  ;;  %858 = vperm.xlu0 %1647, %v824_v47   ;;  %863 = vperm.xlu1 %1648, %v825_v48   ;;  %v383_v47 = vld [vmem:[%s2386_s2 + $0x78] sm:$0xff] }
  0x1a   : > { %v361_v2 = vld [vmem:[%s341_s23 + $0x8] sm:$0xff]  ;;  %v363_v3 = vld [vmem:[%s341_s23 + $0x18] sm:$0xff]  ;;  %v360_v4 = vld [vmem:[%s341_s23] sm:$0xff]  ;;  %s320_s15 = sand.u32 1, %s1718_s25  }
  0x1b   : > { %v1496_v5 = vpack.c.bf16 %v363_v3, %v361_v2  ;;  %v362_v6 = vld [vmem:[%s341_s23 + $0x10] sm:$0xff]  ;;  %v365_v7 = vld [vmem:[%s341_s23 + $0x28] sm:$0xff]  ;;  %v367_v8 = vld [vmem:[%s341_s23 + $0x38] sm:$0xff]  ;;  %s1451_s16 = sshll.u32 %s320_s15, 7  ;;  %s2338_s27 = scalar_lea.sflag [#allocation3], %s320_s15 }
  0x1c   : > { %v1498_v9 = vpack.c.bf16 %v362_v6, %v360_v4  ;;  %v1500_v10 = vpack.c.bf16 %v367_v8, %v365_v7  ;;  %v364_v11 = vld [vmem:[%s341_s23 + $0x20] sm:$0xff]  ;;  %v366_v12 = vld [vmem:[%s341_s23 + $0x30] sm:$0xff]  ;;  %v1849_v13 = vld [vmem:[%s1843_s20 + $0x8] sm:$0xff]  ;;  %s2283_s17 = scalar_lea.vmem [#allocation2], %s1451_s16  ;;  %s2330_s23 = scalar_lea.hbm %s2391_s7, %s1495_s18 }
  0x1d   : > { %1497 = vmatprep.subr.bf16.mxu0 %v1496_v5  ;;  %v1852_v14 = vld [vmem:[%s1843_s20 + $0x18] sm:$0xff]  ;;  %1552 = vmatprep.subr.bf16.mxu1 %v1496_v5  ;;  %v1502_v15 = vpack.c.bf16 %v366_v12, %v364_v11  ;;  %v1857_v17 = vld [vmem:[%s1843_s20] sm:$0xff]  ;;  %v1860_v18 = vld [vmem:[%s1843_s20 + $0x10] sm:$0xff]  ;;  %s1349_s19 = sshll.u32 %s2283_s17, 4  ;;  %s2332_s19 = int_to_ptr.vmem [resolvable:$true] %s1349_s19 }
  0x1e   : > { %1499 = vmatpush1.bf16.msra.mxu0 %v1498_v9  ;;  %1554 = vmatpush1.bf16.msra.mxu1 %v1498_v9  ;;  %v1504_v16 = vpack.c.bf16 %v1852_v14, %v1849_v13  ;;  %v1863_v19 = vld [vmem:[%s1843_s20 + $0x28] sm:$0xff]  ;;  %v351_v20 = vld [vmem:[%s1843_s20 + $0x38] sm:$0xff]  ;;  %v1506_v22 = vpack.c.bf16 %v1860_v18, %v1857_v17  ;;  %v1876_v25 = vld [vmem:[%s1843_s20 + $0x20] sm:$0xff]  ;;  %p1663_p1 = scmp.lt.s32.totalorder %s2332_s19, %s1661_s8 }
  0x1f   : > { %1501 = vmatprep.subr.bf16.mxu0 %v1500_v10  ;;  %1553 = vmatprep.subr.bf16.mxu1 %v1500_v10  ;;  %v1508_v24 = vpack.c.bf16 %v351_v20, %v1863_v19  ;;  %v1879_v26 = vld [vmem:[%s1843_s20 + $0x30] sm:$0xff]  ;;  %v353_v27 = vld [vmem:[%s1843_s20 + $0x48] sm:$0xff]  ;;  %v355_v28 = vld [vmem:[%s1843_s20 + $0x58] sm:$0xff] }
  0x20   : > { %v1510_v31 = vpack.c.bf16 %v1879_v26, %v1876_v25  ;;  %v1512_v34 = vpack.c.bf16 %v355_v28, %v353_v27  ;;  %v1901_v35 = vld [vmem:[%s1843_s20 + $0x40] sm:$0xff]  ;;  %v354_v36 = vld [vmem:[%s1843_s20 + $0x50] sm:$0xff]  ;;  %v357_v37 = vld [vmem:[%s1843_s20 + $0x68] sm:$0xff]  ;;  %868 = vperm.xlu0 %1647, %v826_v52   ;;  %873 = vperm.xlu1 %1648, %v827_v53  }
  0x21   : > { %v359_v38 = vld [vmem:[%s1843_s20 + $0x78] sm:$0xff]  ;;  %v1514_v42 = vpack.c.bf16 %v354_v36, %v1901_v35  ;;  %v1924_v45 = vld [vmem:[%s1843_s20 + $0x60] sm:$0xff]  ;;  %v358_v46 = vld [vmem:[%s1843_s20 + $0x70] sm:$0xff] }
  0x22   : > { %1503 = vmatpush1.bf16.msra.mxu0 %v1502_v15  ;;  %1555 = vmatpush1.bf16.msra.mxu1 %v1502_v15  ;;  %v1516_v44 = vpack.c.bf16 %v359_v38, %v357_v37  ;;  %v1518_v50 = vpack.c.bf16 %v358_v46, %v1924_v45  ;;  %v833_v2 = vld [vmem:[%s2388_s4 + $0x68] sm:$0xff]  ;;  %v391_v3 = vld [vmem:[%s2387_s3 + $0x38] sm:$0xff]  ;;  %v834_v5 = vld [vmem:[%s2388_s4 + $0x70] sm:$0xff] }
  0x23   : > { %1505 = vmatprep.subr.bf16.mxu0 %v1504_v16  ;;  %v399_v4 = vld [vmem:[%s2387_s3 + $0x78] sm:$0xff]  ;;  %v368_v7 = vld [vmem:[%s2386_s2] sm:$0xff]  ;;  %v1029_v9 = vld [vmem:[%s2390_s6 + $0x8] sm:$0xff] }
  0x24   : > { %878 = vperm.xlu0 %1647, %v828_v56   ;;  %883 = vperm.xlu1 %1648, %v829_v57   ;;  %v835_v6 = vld [vmem:[%s2388_s4 + $0x78] sm:$0xff]  ;;  %v1028_v8 = vld [vmem:[%s2390_s6] sm:$0xff]  ;;  %v369_v10 = vld [vmem:[%s2386_s2 + $0x8] sm:$0xff] }
  0x25   : > { %1456 = vmatmul.mubr.msk.f32.vlgmr.msra.gmra.mrb[0].mxu0 %vm400_vm0, %v384_v21  ;;  %1464 = vmatmul.mubr.msk.f32.vlgmr.msra.gmra.mrb[0].mxu1 %vm400_vm0, %v392_v23  ;;  %v1030_v11 = vld [vmem:[%s2390_s6 + $0x10] sm:$0xff]  ;;  %v1031_v12 = vld [vmem:[%s2390_s6 + $0x18] sm:$0xff]  ;;  %v1032_v16 = vld [vmem:[%s2390_s6 + $0x20] sm:$0xff] }
  0x26   : > { %1507 = vmatpush1.bf16.msra.mxu0 %v1506_v22  ;;  %519 = vmatprep.mubr.f32.mxu0 %v1736_v0  ;;  %v370_v15 = vld [vmem:[%s2386_s2 + $0x10] sm:$0xff]  ;;  %v1033_v20 = vld [vmem:[%s2390_s6 + $0x28] sm:$0xff]  ;;  %v371_v21 = vld [vmem:[%s2386_s2 + $0x18] sm:$0xff] }
  0x27   : > { %1509 = vmatprep.subr.bf16.mxu0 %v1508_v24  ;;  %567 = vmatprep.mubr.f32.mxu1 %v1736_v0  ;;  %v1034_v22 = vld [vmem:[%s2390_s6 + $0x30] sm:$0xff]  ;;  %v1035_v23 = vld [vmem:[%s2390_s6 + $0x38] sm:$0xff]  ;;  %v372_v24 = vld [vmem:[%s2386_s2 + $0x20] sm:$0xff] }
  0x28   : > { %888 = vperm.xlu0 %1647, %v830_v60   ;;  %893 = vperm.xlu1 %1648, %v831_v61   ;;  %v1036_v27 = vld [vmem:[%s2390_s6 + $0x40] sm:$0xff]  ;;  %v1037_v28 = vld [vmem:[%s2390_s6 + $0x48] sm:$0xff]  ;;  %v375_v36 = vld [vmem:[%s2386_s2 + $0x38] sm:$0xff] }
  0x29   : > { %1457 = vmatmul.mubr.msk.f32.gmra.mrb[2].mxu0 %vm400_vm0, %v385_v30  ;;  %1465 = vmatmul.mubr.msk.f32.gmra.mrb[2].mxu1 %vm400_vm0, %v393_v32  ;;  %v1038_v30 = vld [vmem:[%s2390_s6 + $0x50] sm:$0xff]  ;;  %v1043_v38 = vld [vmem:[%s2390_s6 + $0x78] sm:$0xff] }
  0x2a   : > { %525 = vmatprep.mubr.f32.mxu0 %v1736_v0  ;;  %1511 = vmatpush1.bf16.msra.mxu0 %v1510_v31  ;;  %v1039_v31 = vld [vmem:[%s2390_s6 + $0x58] sm:$0xff]  ;;  %v374_v32 = vld [vmem:[%s2386_s2 + $0x30] sm:$0xff] }
  0x2b   : > { %1513 = vmatprep.subr.bf16.mxu0 %v1512_v34  ;;  %573 = vmatprep.mubr.f32.mxu1 %v1736_v0  ;;  %v1041_v34 = vld [vmem:[%s2390_s6 + $0x68] sm:$0xff]  ;;  %v1042_v37 = vld [vmem:[%s2390_s6 + $0x70] sm:$0xff] }
  0x2c   : > { %898 = vperm.xlu0 %1647, %v832_v1   ;;  %903 = vperm.xlu1 %1648, %v833_v2   ;;  %v382_v46 = vld [vmem:[%s2386_s2 + $0x70] sm:$0xff] }
  0x2d   : > { %1458 = vmatmul.mubr.msk.f32.gmra.mrb[4].mxu0 %vm400_vm0, %v386_v41  ;;  %1466 = vmatmul.mubr.msk.f32.gmra.mrb[4].mxu1 %vm400_vm0, %v394_v43  ;;  %v378_v41 = vld [vmem:[%s2386_s2 + $0x50] sm:$0xff]  ;;  %v380_v43 = vld [vmem:[%s2386_s2 + $0x60] sm:$0xff] }
  0x2e   : > { %531 = vmatprep.mubr.f32.mxu0 %v1736_v0  ;;  %1515 = vmatpush1.bf16.msra.mxu0 %v1514_v42  ;;  %v379_v42 = vld [vmem:[%s2386_s2 + $0x58] sm:$0xff] }
  0x2f   : > { %1517 = vmatprep.subr.bf16.mxu0 %v1516_v44  ;;  %579 = vmatprep.mubr.f32.mxu1 %v1736_v0  ;;  %v381_v44 = vld [vmem:[%s2386_s2 + $0x68] sm:$0xff] }
  0x30   : > { %908 = vperm.xlu0 %1647, %v834_v5   ;;  %913 = vperm.xlu1 %1648, %v835_v6  }
  0x31   : > { %1459 = vmatmul.mubr.msk.f32.gmra.mrb[6].mxu0 %vm400_vm0, %v387_v49  ;;  %1467 = vmatmul.mubr.msk.f32.gmra.mrb[6].mxu1 %vm400_vm0, %v395_v51 }
  0x32   : > { %537 = vmatprep.mubr.f32.mxu0 %v1736_v0  ;;  %1519 = vmatpush1.bf16.msra.mxu0 %v1518_v50 }
  0x33   : > { %585 = vmatprep.mubr.f32.mxu1 %v1736_v0 }
  0x34   : > { %1046 = vperm.xlu0 %1647, %v1028_v8   ;;  %1051 = vperm.xlu1 %1648, %v1029_v9  }
  0x35   : > { %1460 = vmatmul.mubr.msk.f32.gmra.mrb[8].mxu0 %vm400_vm0, %v388_v54  ;;  %1468 = vmatmul.mubr.msk.f32.gmra.mrb[8].mxu1 %vm400_vm0, %v396_v55 }
  0x36   : > { %543 = vmatprep.mubr.f32.mxu0 %v1736_v0  ;;  %591 = vmatprep.mubr.f32.mxu1 %v1736_v0 }
  0x38   : > { %1056 = vperm.xlu0 %1647, %v1030_v11   ;;  %1061 = vperm.xlu1 %1648, %v1031_v12  }
  0x39   : > { %1461 = vmatmul.mubr.msk.f32.gmra.mrb[10].mxu0 %vm400_vm0, %v389_v58  ;;  %1469 = vmatmul.mubr.msk.f32.gmra.mrb[10].mxu1 %vm400_vm0, %v397_v59 }
  0x3a   : > { %549 = vmatprep.mubr.f32.mxu0 %v1736_v0  ;;  %597 = vmatprep.mubr.f32.mxu1 %v1736_v0 }
  0x3c   : > { %1066 = vperm.xlu0 %1647, %v1032_v16   ;;  %1071 = vperm.xlu1 %1648, %v1033_v20  }
  0x3d   : > { %1462 = vmatmul.mubr.msk.f32.gmra.mrb[12].mxu0 %vm400_vm0, %v390_v62  ;;  %1470 = vmatmul.mubr.msk.f32.gmra.mrb[12].mxu1 %vm400_vm0, %v398_v63 }
  0x3e   : > { %555 = vmatprep.mubr.f32.mxu0 %v1736_v0  ;;  %603 = vmatprep.mubr.f32.mxu1 %v1736_v0 }
  0x40   : > { %1076 = vperm.xlu0 %1647, %v1034_v22   ;;  %1081 = vperm.xlu1 %1648, %v1035_v23  }
  0x41   : > { %1463 = vmatmul.mubr.msk.f32.gmra.mrb[14].mxu0 %vm400_vm0, %v391_v3  ;;  %1471 = vmatmul.mubr.msk.f32.gmra.mrb[14].mxu1 %vm400_vm0, %v399_v4 }
  0x42   : > { %723 = vmatprep.mubr.f32.mxu0 %v1736_v0  ;;  %1188 = vmatprep.mubr.f32.mxu1 %v1736_v0 }
  0x44   : > { %1086 = vperm.xlu0 %1647, %v1036_v27   ;;  %1091 = vperm.xlu1 %1648, %v1037_v28  }
  0x45   : > { %1472 = vmatmul.mubr.msk.f32.vlgmr.msra.gmra.mrb[0].mxu0 %vm610_vm1, %v368_v7 }
  0x46   : > { %729 = vmatprep.mubr.f32.mxu0 %v1736_v0 }
  0x48   : > { %1096 = vperm.xlu0 %1647, %v1038_v30   ;;  %1101 = vperm.xlu1 %1648, %v1039_v31  }
  0x49   : > { %1473 = vmatmul.mubr.msk.f32.gmra.mrb[2].mxu0 %vm610_vm1, %v369_v10 }
  0x4a   : > { %735 = vmatprep.mubr.f32.mxu0 %v1736_v0 }
  0x4c   : > { %1106 = vperm.xlu0 %1647, %v1040_v33   ;;  %1111 = vperm.xlu1 %1648, %v1041_v34  }
  0x4d   : > { %1474 = vmatmul.mubr.msk.f32.gmra.mrb[4].mxu0 %vm610_vm1, %v370_v15 }
  0x4e   : > { %741 = vmatprep.mubr.f32.mxu0 %v1736_v0 }
  0x50   : > { %1116 = vperm.xlu0 %1647, %v1042_v37   ;;  %1121 = vperm.xlu1 %1648, %v1043_v38  }
  0x51   : > { %1475 = vmatmul.mubr.msk.f32.gmra.mrb[6].mxu0 %vm610_vm1, %v371_v21 }
  0x52   : > { %747 = vmatprep.mubr.f32.mxu0 %v1736_v0 }
  0x55   : > { %1476 = vmatmul.mubr.msk.f32.gmra.mrb[8].mxu0 %vm610_vm1, %v372_v24 }
  0x56   : > { %753 = vmatprep.mubr.f32.mxu0 %v1736_v0 }
  0x59   : > { %1477 = vmatmul.mubr.msk.f32.gmra.mrb[10].mxu0 %vm610_vm1, %v373_v29 }
  0x5a   : > { %759 = vmatprep.mubr.f32.mxu0 %v1736_v0 }
  0x5d   : > { %1478 = vmatmul.mubr.msk.f32.gmra.mrb[12].mxu0 %vm610_vm1, %v374_v32 }
  0x5e   : > { %765 = vmatprep.mubr.f32.mxu0 %v1736_v0 }
  0x61   : > { %1479 = vmatmul.mubr.msk.f32.gmra.mrb[14].mxu0 %vm610_vm1, %v375_v36 }
  0x62   : > { %771 = vmatprep.mubr.f32.mxu0 %v1736_v0 }
  0x65   : > { %1480 = vmatmul.mubr.msk.f32.gmra.mrb[16].mxu0 %vm610_vm1, %v376_v39 }
  0x66   : > { %777 = vmatprep.mubr.f32.mxu0 %v1736_v0 }
  0x69   : > { %1481 = vmatmul.mubr.msk.f32.gmra.mrb[18].mxu0 %vm610_vm1, %v377_v40 }
  0x6a   : > { %783 = vmatprep.mubr.f32.mxu0 %v1736_v0 }
  0x6d   : > { %1482 = vmatmul.mubr.msk.f32.gmra.mrb[20].mxu0 %vm610_vm1, %v378_v41 }
  0x6e   : > { %789 = vmatprep.mubr.f32.mxu0 %v1736_v0 }
  0x71   : > { %1483 = vmatmul.mubr.msk.f32.gmra.mrb[22].mxu0 %vm610_vm1, %v379_v42 }
  0x72   : > { %795 = vmatprep.mubr.f32.mxu0 %v1736_v0 }
  0x75   : > { %1484 = vmatmul.mubr.msk.f32.gmra.mrb[24].mxu0 %vm610_vm1, %v380_v43 }
  0x76   : > { %801 = vmatprep.mubr.f32.mxu0 %v1736_v0 }
  0x79   : > { %1485 = vmatmul.mubr.msk.f32.gmra.mrb[26].mxu0 %vm610_vm1, %v381_v44 }
  0x7a   : > { %807 = vmatprep.mubr.f32.mxu0 %v1736_v0 }
  0x7d   : > { %1486 = vmatmul.mubr.msk.f32.gmra.mrb[28].mxu0 %vm610_vm1, %v382_v46 }
  0x7e   : > { %813 = vmatprep.mubr.f32.mxu0 %v1736_v0 }
  0x81   : > { %1487 = vmatmul.mubr.msk.f32.gmra.mrb[30].mxu0 %vm610_vm1, %v383_v47 }
  0x90   : > { %v839_v1 = vpop.permute.xlu0 %838  ;;  %v849_v11 = vpop.permute.xlu1 %848 }
  0x94   : > { %v844_v6 = vpop.permute.xlu0 %843  ;;  %v854_v32 = vpop.permute.xlu1 %853 }
  0x98   : > { %v859_v42 = vpop.permute.xlu0 %858 }
  0xf8   : > { %v2146_v48 = vpop.f32.mrb[0].mxu1 }
  0xf9   : > { %v2148_v49 = vpop.f32.mrb[1].mxu1 }
  0xfc   : > { %v2150_v50 = vpop.f32.mrb[2].mxu1 }
  0xfd   : > { %v2152_v51 = vpop.f32.mrb[3].mxu1 }
 0x100   : > { %v2154_v52 = vpop.f32.mrb[4].mxu1 }
 0x101   : > { %v2156_v53 = vpop.f32.mrb[5].mxu1 }
 0x104   : > { %v2158_v54 = vpop.f32.mrb[6].mxu1 }
 0x105   : > { %v2160_v55 = vpop.f32.mrb[7].mxu1 }
 0x108   : > { %v2162_v56 = vpop.f32.mrb[8].mxu1 }
 0x109   : > { %v2164_v57 = vpop.f32.mrb[9].mxu1 }
 0x10c   : > { %v2166_v58 = vpop.f32.mrb[10].mxu1 }
 0x10d   : > { %v2168_v59 = vpop.f32.mrb[11].mxu1 }
 0x110   : > { %v2170_v60 = vpop.f32.mrb[12].mxu1 }
 0x111   : > { %v2172_v61 = vpop.f32.mrb[13].mxu1 }
 0x114   : > { %v2174_v62 = vpop.f32.mrb[14].mxu1 }
 0x115   : > { %v2176_v63 = vpop.f32.mrb[15].mxu1 }
 0x118   : > { %v725_v2 = vpop.f32.mrb[0].mxu0 }
 0x119   : > { %v916_v3 = vadd.f32 %v839_v1, %v725_v2  ;;  %v727_v4 = vpop.f32.mrb[1].mxu0 }
 0x11a   : > { %v917_v5 = vadd.f32 %v839_v1, %v727_v4 }
 0x11b   : > { %v948_v8 = vmul.f32 0.1, %v916_v3 }
 0x11c   : > { %v731_v7 = vpop.f32.mrb[2].mxu0  ;;  %v949_v12 = vmul.f32 0.1, %v917_v5 }
 0x11d   : > { %v918_v9 = vadd.f32 %v844_v6, %v731_v7  ;;  %v733_v10 = vpop.f32.mrb[3].mxu0  ;;  %v980_v22 = vmax.f32 %v916_v3, %v948_v8  ;;  %v864_v7 = vpop.permute.xlu1 %863 }
 0x11e   : > { %v919_v15 = vadd.f32 %v844_v6, %v733_v10  ;;  %v981_v28 = vmax.f32 %v917_v5, %v949_v12 }
 0x11f   : > { %v950_v16 = vmul.f32 0.1, %v918_v9 }
 0x120   : > { %v951_v20 = vmul.f32 0.1, %v919_v15  ;;  %v737_v21 = vpop.f32.mrb[4].mxu0 }
 0x121   : > { %v982_v23 = vmax.f32 %v918_v9, %v950_v16  ;;  %v920_v24 = vadd.f32 %v849_v11, %v737_v21  ;;  %v739_v27 = vpop.f32.mrb[5].mxu0  ;;  %v869_v21 = vpop.permute.xlu0 %868 }
 0x122   : > { %v983_v29 = vmax.f32 %v919_v15, %v951_v20  ;;  %v921_v30 = vadd.f32 %v849_v11, %v739_v27 }
 0x123   : > { %v1522_v31 = vpack.c.bf16 %v982_v23, %v980_v22  ;;  %v952_v36 = vmul.f32 0.1, %v920_v24 }
 0x124   : > { %v743_v33 = vpop.f32.mrb[6].mxu0  ;;  %v1520_v34 = vpack.c.bf16 %v983_v29, %v981_v28  ;;  %v953_v39 = vmul.f32 0.1, %v921_v30 }
 0x125   : > { %v922_v37 = vadd.f32 %v854_v32, %v743_v33  ;;  %v745_v38 = vpop.f32.mrb[7].mxu0  ;;  %v984_v46 = vmax.f32 %v920_v24, %v952_v36 }
 0x126   : > { %v923_v40 = vadd.f32 %v854_v32, %v745_v38  ;;  %1521 = vmatprep.subr.bf16.mxu1 %v1520_v34  ;;  %v985_v3 = vmax.f32 %v921_v30, %v953_v39  ;;  %v874_v34 = vpop.permute.xlu1 %873 }
 0x127   : > { %v954_v41 = vmul.f32 0.1, %v922_v37  ;;  %1523 = vmatpush1.bf16.msra.mxu1 %v1522_v31 }
 0x128   : > { %v955_v43 = vmul.f32 0.1, %v923_v40  ;;  %v749_v44 = vpop.f32.mrb[8].mxu0 }
 0x129   : > { %v986_v47 = vmax.f32 %v922_v37, %v954_v41  ;;  %v924_v1 = vadd.f32 %v859_v42, %v749_v44  ;;  %v751_v2 = vpop.f32.mrb[9].mxu0 }
 0x12a   : > { %v987_v4 = vmax.f32 %v923_v40, %v955_v43  ;;  %v925_v5 = vadd.f32 %v859_v42, %v751_v2 }
 0x12b   : > { %v1526_v6 = vpack.c.bf16 %v986_v47, %v984_v46  ;;  %v956_v10 = vmul.f32 0.1, %v924_v1 }
 0x12c   : > { %v755_v8 = vpop.f32.mrb[10].mxu0  ;;  %v1524_v9 = vpack.c.bf16 %v987_v4, %v985_v3  ;;  %v957_v15 = vmul.f32 0.1, %v925_v5  ;;  %v879_v4 = vpop.permute.xlu0 %878 }
 0x12d   : > { %v926_v11 = vadd.f32 %v864_v7, %v755_v8  ;;  %v757_v12 = vpop.f32.mrb[11].mxu0  ;;  %v988_v24 = vmax.f32 %v924_v1, %v956_v10 }
 0x12e   : > { %v927_v16 = vadd.f32 %v864_v7, %v757_v12  ;;  %1525 = vmatprep.subr.bf16.mxu1 %v1524_v9  ;;  %v989_v30 = vmax.f32 %v925_v5, %v957_v15 }
 0x12f   : > { %v958_v20 = vmul.f32 0.1, %v926_v11  ;;  %1527 = vmatpush1.bf16.msra.mxu1 %v1526_v6 }
 0x130   : > { %v959_v22 = vmul.f32 0.1, %v927_v16  ;;  %v761_v23 = vpop.f32.mrb[12].mxu0 }
 0x131   : > { %v990_v27 = vmax.f32 %v926_v11, %v958_v20  ;;  %v928_v28 = vadd.f32 %v869_v21, %v761_v23  ;;  %v763_v29 = vpop.f32.mrb[13].mxu0  ;;  %v884_v20 = vpop.permute.xlu1 %883 }
 0x132   : > { %v991_v31 = vmax.f32 %v927_v16, %v959_v22  ;;  %v929_v32 = vadd.f32 %v869_v21, %v763_v29 }
 0x133   : > { %v1530_v33 = vpack.c.bf16 %v990_v27, %v988_v24  ;;  %v960_v38 = vmul.f32 0.1, %v928_v28 }
 0x134   : > { %v767_v36 = vpop.f32.mrb[14].mxu0  ;;  %v1528_v37 = vpack.c.bf16 %v991_v31, %v989_v30  ;;  %v961_v41 = vmul.f32 0.1, %v929_v32  ;;  %v889_v30 = vpop.permute.xlu0 %888 }
 0x135   : > { %v930_v39 = vadd.f32 %v874_v34, %v767_v36  ;;  %v769_v40 = vpop.f32.mrb[15].mxu0  ;;  %v992_v47 = vmax.f32 %v928_v28, %v960_v38 }
 0x136   : > { %v931_v42 = vadd.f32 %v874_v34, %v769_v40  ;;  %1529 = vmatprep.subr.bf16.mxu1 %v1528_v37  ;;  %v993_v5 = vmax.f32 %v929_v32, %v961_v41 }
 0x137   : > { %v962_v43 = vmul.f32 0.1, %v930_v39  ;;  %1531 = vmatpush1.bf16.msra.mxu1 %v1530_v33 }
 0x138   : > { %v963_v44 = vmul.f32 0.1, %v931_v42  ;;  %v773_v46 = vpop.f32.mrb[16].mxu0 }
 0x139   : > { %v994_v1 = vmax.f32 %v930_v39, %v962_v43  ;;  %v774_v2 = vadd.f32 %v773_v46, %v2146_v48  ;;  %v775_v3 = vpop.f32.mrb[17].mxu0 }
 0x13a   : > { %v995_v6 = vmax.f32 %v931_v42, %v963_v44  ;;  %v776_v7 = vadd.f32 %v775_v3, %v2148_v49  ;;  %v894_v42 = vpop.permute.xlu1 %893 }
 0x13b   : > { %v1534_v8 = vpack.c.bf16 %v994_v1, %v992_v47  ;;  %v932_v9 = vadd.f32 %v879_v4, %v774_v2 }
 0x13c   : > { %v933_v10 = vadd.f32 %v879_v4, %v776_v7  ;;  %v779_v11 = vpop.f32.mrb[18].mxu0  ;;  %v1532_v12 = vpack.c.bf16 %v995_v6, %v993_v5  ;;  %v899_v5 = vpop.permute.xlu0 %898 }
 0x13d   : > { %v780_v15 = vadd.f32 %v779_v11, %v2150_v50  ;;  %v781_v16 = vpop.f32.mrb[19].mxu0  ;;  %v964_v22 = vmul.f32 0.1, %v932_v9 }
 0x13e   : > { %v782_v21 = vadd.f32 %v781_v16, %v2152_v51  ;;  %1533 = vmatprep.subr.bf16.mxu1 %v1532_v12  ;;  %v965_v23 = vmul.f32 0.1, %v933_v10 }
 0x13f   : > { %v934_v48 = vadd.f32 %v884_v20, %v780_v15  ;;  %1535 = vmatpush1.bf16.msra.mxu1 %v1534_v8  ;;  %v996_v50 = vmax.f32 %v932_v9, %v964_v22 }
 0x140   : > { %v935_v24 = vadd.f32 %v884_v20, %v782_v21  ;;  %v785_v27 = vpop.f32.mrb[20].mxu0  ;;  %v997_v36 = vmax.f32 %v933_v10, %v965_v23  ;;  %v904_v21 = vpop.permute.xlu1 %903 }
 0x141   : > { %v966_v28 = vmul.f32 0.1, %v934_v48  ;;  %v786_v49 = vadd.f32 %v785_v27, %v2154_v52  ;;  %v787_v29 = vpop.f32.mrb[21].mxu0 }
 0x142   : > { %v967_v31 = vmul.f32 0.1, %v935_v24  ;;  %v788_v32 = vadd.f32 %v787_v29, %v2156_v53 }
 0x143   : > { %v998_v33 = vmax.f32 %v934_v48, %v966_v28  ;;  %v936_v34 = vadd.f32 %v889_v30, %v786_v49 }
 0x144   : > { %v999_v51 = vmax.f32 %v935_v24, %v967_v31  ;;  %v937_v37 = vadd.f32 %v889_v30, %v788_v32  ;;  %v791_v38 = vpop.f32.mrb[22].mxu0  ;;  %v909_v30 = vpop.permute.xlu0 %908 }
 0x145   : > { %v1538_v39 = vpack.c.bf16 %v998_v33, %v996_v50  ;;  %v792_v40 = vadd.f32 %v791_v38, %v2158_v54  ;;  %v793_v41 = vpop.f32.mrb[23].mxu0  ;;  %v968_v44 = vmul.f32 0.1, %v936_v34 }
 0x146   : > { %v794_v43 = vadd.f32 %v793_v41, %v2160_v55  ;;  %v1536_v52 = vpack.c.bf16 %v999_v51, %v997_v36  ;;  %v969_v47 = vmul.f32 0.1, %v937_v37 }
 0x147   : > { %v938_v46 = vadd.f32 %v894_v42, %v792_v40  ;;  %v1000_v7 = vmax.f32 %v936_v34, %v968_v44  ;;  %v914_v40 = vpop.permute.xlu1 %913 }
 0x148   : > { %v939_v1 = vadd.f32 %v894_v42, %v794_v43  ;;  %v797_v53 = vpop.f32.mrb[24].mxu0  ;;  %1537 = vmatprep.subr.bf16.mxu1 %v1536_v52  ;;  %v1001_v55 = vmax.f32 %v937_v37, %v969_v47 }
 0x149   : > { %v970_v2 = vmul.f32 0.1, %v938_v46  ;;  %v798_v3 = vadd.f32 %v797_v53, %v2162_v56  ;;  %v799_v4 = vpop.f32.mrb[25].mxu0  ;;  %1539 = vmatpush1.bf16.msra.mxu1 %v1538_v39 }
 0x14a   : > { %v971_v6 = vmul.f32 0.1, %v939_v1  ;;  %v800_v54 = vadd.f32 %v799_v4, %v2164_v57 }
 0x14b   : > { %v1002_v8 = vmax.f32 %v938_v46, %v970_v2  ;;  %v940_v9 = vadd.f32 %v899_v5, %v798_v3 }
 0x14c   : > { %v1003_v10 = vmax.f32 %v939_v1, %v971_v6  ;;  %v941_v11 = vadd.f32 %v899_v5, %v800_v54  ;;  %v803_v12 = vpop.f32.mrb[26].mxu0  ;;  %v1014_v5 = vld [vmem:[%s2389_s5 + $0x10] sm:$0xff]  ;;  %v1015_v6 = vld [vmem:[%s2389_s5 + $0x18] sm:$0xff]  ;;  %v1016_v54 = vld [vmem:[%s2389_s5 + $0x20] sm:$0xff] }
 0x14d   : > { %v1542_v15 = vpack.c.bf16 %v1002_v8, %v1000_v7  ;;  %v804_v16 = vadd.f32 %v803_v12, %v2166_v58  ;;  %v805_v20 = vpop.f32.mrb[27].mxu0  ;;  %v972_v48 = vmul.f32 0.1, %v940_v9  ;;  %v1017_v7 = vld [vmem:[%s2389_s5 + $0x28] sm:$0xff]  ;;  %v1018_v8 = vld [vmem:[%s2389_s5 + $0x30] sm:$0xff]  ;;  %v1023_v12 = vld [vmem:[%s2389_s5 + $0x58] sm:$0xff] }
 0x14e   : > { %v806_v56 = vadd.f32 %v805_v20, %v2168_v59  ;;  %v1540_v22 = vpack.c.bf16 %v1003_v10, %v1001_v55  ;;  %v973_v24 = vmul.f32 0.1, %v941_v11  ;;  %v1020_v55 = vld [vmem:[%s2389_s5 + $0x40] sm:$0xff]  ;;  %v1021_v10 = vld [vmem:[%s2389_s5 + $0x48] sm:$0xff]  ;;  %v1026_v20 = vld [vmem:[%s2389_s5 + $0x70] sm:$0xff] }
 0x14f   : > { %v942_v23 = vadd.f32 %v904_v21, %v804_v16  ;;  %v1004_v32 = vmax.f32 %v940_v9, %v972_v48  ;;  %v1019_v9 = vld [vmem:[%s2389_s5 + $0x38] sm:$0xff]  ;;  %v1025_v16 = vld [vmem:[%s2389_s5 + $0x68] sm:$0xff] }
 0x150   : > { %v943_v27 = vadd.f32 %v904_v21, %v806_v56  ;;  %v809_v57 = vpop.f32.mrb[28].mxu0  ;;  %1541 = vmatprep.subr.bf16.mxu1 %v1540_v22  ;;  %v1005_v59 = vmax.f32 %v941_v11, %v973_v24  ;;  %v1022_v11 = vld [vmem:[%s2389_s5 + $0x50] sm:$0xff]  ;;  %v1027_v21 = vld [vmem:[%s2389_s5 + $0x78] sm:$0xff]  ;;  %v1047_v24 = vpop.permute.xlu0 %1046 }
 0x151   : > { %v974_v28 = vmul.f32 0.1, %v942_v23  ;;  %v810_v49 = vadd.f32 %v809_v57, %v2170_v60  ;;  %v811_v29 = vpop.f32.mrb[29].mxu0  ;;  %1543 = vmatpush1.bf16.msra.mxu1 %v1542_v15  ;;  %v1024_v15 = vld [vmem:[%s2389_s5 + $0x60] sm:$0xff] }
 0x152   : > { %v975_v31 = vmul.f32 0.1, %v943_v27  ;;  %v812_v58 = vadd.f32 %v811_v29, %v2172_v61 }
 0x153   : > { %v1006_v50 = vmax.f32 %v942_v23, %v974_v28  ;;  %v944_v33 = vadd.f32 %v909_v30, %v810_v49  ;;  %v1052_v28 = vpop.permute.xlu1 %1051 }
 0x154   : > { %v1007_v34 = vmax.f32 %v943_v27, %v975_v31  ;;  %v945_v36 = vadd.f32 %v909_v30, %v812_v58  ;;  %v815_v51 = vpop.f32.mrb[30].mxu0  ;;  %v1057_v30 = vpop.permute.xlu0 %1056 }
 0x155   : > { %v1546_v37 = vpack.c.bf16 %v1006_v50, %v1004_v32  ;;  %v816_v38 = vadd.f32 %v815_v51, %v2174_v62  ;;  %v817_v39 = vpop.f32.mrb[31].mxu0  ;;  %v976_v42 = vmul.f32 0.1, %v944_v33  ;;  %v1012_v62 = vld [vmem:[%s2389_s5] sm:$0xff] }
 0x156   : > { %v818_v60 = vadd.f32 %v817_v39, %v2176_v63  ;;  %v1544_v41 = vpack.c.bf16 %v1007_v34, %v1005_v59  ;;  %v977_v52 = vmul.f32 0.1, %v945_v36  ;;  %v1013_v63 = vld [vmem:[%s2389_s5 + $0x8] sm:$0xff] }
 0x157   : > { %v946_v43 = vadd.f32 %v914_v40, %v816_v38  ;;  %v1008_v47 = vmax.f32 %v944_v33, %v976_v42  ;;  %v1062_v58 = vpop.permute.xlu1 %1061 }
 0x158   : > { %v947_v44 = vadd.f32 %v914_v40, %v818_v60  ;;  %1545 = vmatprep.subr.bf16.mxu1 %v1544_v41  ;;  %v1009_v53 = vmax.f32 %v945_v36, %v977_v52  ;;  %v1067_v32 = vpop.permute.xlu0 %1066 }
 0x159   : > { %v978_v61 = vmul.f32 0.1, %v946_v43  ;;  %1547 = vmatpush1.bf16.msra.mxu1 %v1546_v37 }
 0x15a   : > { %v979_v46 = vmul.f32 0.1, %v947_v44 }
 0x15b   : > { %v1010_v1 = vmax.f32 %v946_v43, %v978_v61  ;;  %v2263_v59 = vpop.permute.xlu1 %1071 }
 0x15c   : > { %v1011_v2 = vmax.f32 %v947_v44, %v979_v46  ;;  %v2269_v51 = vpop.permute.xlu0 %1076 }
 0x15d   : > { %v1550_v3 = vpack.c.bf16 %v1010_v1, %v1008_v47 }
 0x15e   : > { %v1548_v4 = vpack.c.bf16 %v1011_v2, %v1009_v53 }
 0x15f   : > { %v2276_v40 = vpop.permute.xlu1 %1081 }
 0x160   : > { %1549 = vmatprep.subr.bf16.mxu1 %v1548_v4  ;;  %v1087_v41 = vpop.permute.xlu0 %1086 }
 0x161   : > { %1551 = vmatpush1.bf16.msra.mxu1 %v1550_v3 }
 0x163   : > { %v1092_v2 = vpop.permute.xlu1 %1091 }
 0x164   : > { %1189 = vmatmul.mubr.f32.vlgmr.msra.gmra.mrb[16].mxu1 %v1012_v62 }
 0x165   : > { %1194 = vmatprep.mubr.f32.mxu1 %v1736_v0 }
 0x168   : > { %1195 = vmatmul.mubr.f32.gmra.mrb[18].mxu1 %v1013_v63 }
 0x169   : > { %1200 = vmatprep.mubr.f32.mxu1 %v1736_v0 }
 0x16c   : > { %1201 = vmatmul.mubr.f32.gmra.mrb[20].mxu1 %v1014_v5 }
 0x16d   : > { %1206 = vmatprep.mubr.f32.mxu1 %v1736_v0 }
 0x170   : > { %1207 = vmatmul.mubr.f32.gmra.mrb[22].mxu1 %v1015_v6 }
 0x171   : > { %1212 = vmatprep.mubr.f32.mxu1 %v1736_v0 }
 0x174   : > { %1213 = vmatmul.mubr.f32.gmra.mrb[24].mxu1 %v1016_v54 }
 0x175   : > { %1218 = vmatprep.mubr.f32.mxu1 %v1736_v0 }
 0x178   : > { %1219 = vmatmul.mubr.f32.gmra.mrb[26].mxu1 %v1017_v7 }
 0x179   : > { %1224 = vmatprep.mubr.f32.mxu1 %v1736_v0 }
 0x17c   : > { %1225 = vmatmul.mubr.f32.gmra.mrb[28].mxu1 %v1018_v8  ;;  %v1097_v8 = vpop.permute.xlu0 %1096 }
 0x17d   : > { %1230 = vmatprep.mubr.f32.mxu1 %v1736_v0 }
 0x180   : > { %1231 = vmatmul.mubr.f32.gmra.mrb[30].mxu1 %v1019_v9 }
 0x181   : > { %1236 = vmatprep.mubr.f32.mxu1 %v1736_v0 }
 0x184   : > { %1237 = vmatmul.mubr.f32.gmra.mrb[32].mxu1 %v1020_v55 }
 0x185   : > { %1242 = vmatprep.mubr.f32.mxu1 %v1736_v0 }
 0x188   : > { %1243 = vmatmul.mubr.f32.gmra.mrb[34].mxu1 %v1021_v10 }
 0x189   : > { %1248 = vmatprep.mubr.f32.mxu1 %v1736_v0 }
 0x18c   : > { %1249 = vmatmul.mubr.f32.gmra.mrb[36].mxu1 %v1022_v11 }
 0x18d   : > { %1254 = vmatprep.mubr.f32.mxu1 %v1736_v0 }
 0x190   : > { %1255 = vmatmul.mubr.f32.gmra.mrb[38].mxu1 %v1023_v12 }
 0x191   : > { %1260 = vmatprep.mubr.f32.mxu1 %v1736_v0 }
 0x194   : > { %1261 = vmatmul.mubr.f32.gmra.mrb[40].mxu1 %v1024_v15 }
 0x195   : > { %1266 = vmatprep.mubr.f32.mxu1 %v1736_v0 }
 0x198   : > { %1267 = vmatmul.mubr.f32.gmra.mrb[42].mxu1 %v1025_v16 }
 0x199   : > { %1272 = vmatprep.mubr.f32.mxu1 %v1736_v0 }
 0x19c   : > { %1273 = vmatmul.mubr.f32.gmra.mrb[44].mxu1 %v1026_v20 }
 0x19d   : > { %1278 = vmatprep.mubr.f32.mxu1 %v1736_v0 }
 0x1a0   : > { %1279 = vmatmul.mubr.f32.gmra.mrb[46].mxu1 %v1027_v21  ;;  %v1102_v21 = vpop.permute.xlu1 %1101 }
 0x237   : > { %v1190_v56 = vpop.f32.mrb[16].mxu1 }
 0x238   : > { %v1192_v22 = vpop.f32.mrb[17].mxu1  ;;  %v1191_v38 = vadd.f32 %v1190_v56, %v1047_v24 }
 0x239   : > { %v1193_v60 = vadd.f32 %v1192_v22, %v1047_v24 }
 0x23a   : > { %v1285_v43 = vmul.f32 %v1191_v38, %v1857_v17 }
 0x23b   : > { %v1196_v48 = vpop.f32.mrb[18].mxu1  ;;  %v1286_v46 = vmul.f32 %v1193_v60, %v1849_v13 }
 0x23c   : > { %v1198_v23 = vpop.f32.mrb[19].mxu1  ;;  %v1197_v52 = vadd.f32 %v1196_v48, %v1052_v28 }
 0x23d   : > { %v1199_v47 = vadd.f32 %v1198_v23, %v1052_v28 }
 0x23e   : > { %v1287_v62 = vmul.f32 %v1197_v52, %v1860_v18  ;;  %v1112_v52 = vpop.permute.xlu1 %1111 }
 0x23f   : > { %v1202_v27 = vpop.f32.mrb[20].mxu1  ;;  %v1288_v13 = vmul.f32 %v1199_v47, %v1852_v14 }
 0x240   : > { %v1204_v57 = vpop.f32.mrb[21].mxu1  ;;  %v1203_v63 = vadd.f32 %v1202_v27, %v1057_v30  ;;  %v1649_v27 = vld [vmem:[%s1843_s20 + $0x38] sm:$0xff] }
 0x241   : > { %v1205_v6 = vadd.f32 %v1204_v57, %v1057_v30 }
 0x242   : > { %v1289_v18 = vmul.f32 %v1203_v63, %v1876_v25 }
 0x243   : > { %v1208_v49 = vpop.f32.mrb[22].mxu1  ;;  %v1290_v15 = vmul.f32 %v1205_v6, %v1863_v19  ;;  %v1653_v6 = vld [vmem:[%s1843_s20 + $0x68] sm:$0xff] }
 0x244   : > { %v1210_v29 = vpop.f32.mrb[23].mxu1  ;;  %v1209_v10 = vadd.f32 %v1208_v49, %v1062_v58 }
 0x245   : > { %v1211_v16 = vadd.f32 %v1210_v29, %v1062_v58  ;;  %v1107_v29 = vpop.permute.xlu0 %1106 }
 0x246   : > { %v1291_v48 = vmul.f32 %v1209_v10, %v1879_v26 }
 0x247   : > { %v1214_v31 = vpop.f32.mrb[24].mxu1  ;;  %v1292_v57 = vmul.f32 %v1649_v27, %v1211_v16 }
 0x248   : > { %v2257_v0 = vpop.f32.mrb[25].mxu1  ;;  %v1215_v23 = vadd.f32 %v1214_v31, %v1067_v32 }
 0x249   : > { %v1217_v19 = vadd.f32 %v2257_v0, %v1067_v32 }
 0x24a   : > { %v1293_v26 = vmul.f32 %v1215_v23, %v1901_v35 }
 0x24b   : > { %v2259_v50 = vpop.f32.mrb[26].mxu1 }
 0x24c   : > { %v2261_v33 = vpop.f32.mrb[27].mxu1  ;;  %v1221_v31 = vadd.f32 %v2259_v50, %v2263_v59 }
 0x24d   : > { %v1223_v0 = vadd.f32 %v2261_v33, %v2263_v59 }
 0x24f   : > { %v2265_v34 = vpop.f32.mrb[28].mxu1 }
 0x250   : > { %v2267_v36 = vpop.f32.mrb[29].mxu1  ;;  %v1227_v50 = vadd.f32 %v2265_v34, %v2269_v51 }
 0x251   : > { %v1229_v33 = vadd.f32 %v2267_v36, %v2269_v51 }
 0x252   : > { %v1297_v34 = vmul.f32 %v1227_v50, %v1924_v45 }
 0x253   : > { %v2271_v37 = vpop.f32.mrb[30].mxu1  ;;  %v1298_v36 = vmul.f32 %v1653_v6, %v1229_v33 }
 0x254   : > { %v2274_v39 = vpop.f32.mrb[31].mxu1 }
 0x255   : > { %v1235_v51 = vadd.f32 %v2274_v39, %v2276_v40 }
 0x257   : > { %v1238_v42 = vpop.f32.mrb[32].mxu1 }
 0x258   : > { %v1239_v44 = vadd.f32 %v1238_v42, %v1087_v41  ;;  %v1240_v61 = vpop.f32.mrb[33].mxu1 }
 0x259   : > { %v1241_v1 = vadd.f32 %v1240_v61, %v1087_v41  ;;  %v1650_v41 = vld [vmem:[%s1843_s20 + $0x48] sm:$0xff]  ;;  %v1651_v61 = vld [vmem:[%s1843_s20 + $0x50] sm:$0xff] }
 0x25a   : > { %v1301_v53 = vadd.f32 %v1285_v43, %v1239_v44  ;;  %v1294_v42 = vmul.f32 %v1650_v41, %v1217_v19 }
 0x25b   : > { %v1302_v3 = vadd.f32 %v1286_v46, %v1241_v1  ;;  %v1244_v4 = vpop.f32.mrb[34].mxu1  ;;  %v1295_v46 = vmul.f32 %v1651_v61, %v1221_v31 }
 0x25c   : > { %1317 = vst [vmem:[%s2283_s17] sm:$0xff] %v1301_v53  ;;  %v1245_v17 = vadd.f32 %v1244_v4, %v1092_v2  ;;  %v1246_v5 = vpop.f32.mrb[35].mxu1  ;;  %v1652_v53 = vld [vmem:[%s1843_s20 + $0x58] sm:$0xff]  ;;  %v1117_v4 = vpop.permute.xlu0 %1116 }
 0x25d   : > { %1318 = vst [vmem:[%s2283_s17 + $0x8] sm:$0xff] %v1302_v3  ;;  %v1247_v54 = vadd.f32 %v1246_v5, %v1092_v2  ;;  %v1296_v2 = vmul.f32 %v1652_v53, %v1223_v0 }
 0x25e   : > { %v1303_v7 = vadd.f32 %v1287_v62, %v1245_v17  ;;  %v1233_v17 = vadd.f32 %v2271_v37, %v2276_v40  ;;  %v1654_v37 = vld [vmem:[%s1843_s20 + $0x70] sm:$0xff] }
 0x25f   : > { %v1304_v9 = vadd.f32 %v1288_v13, %v1247_v54  ;;  %v1250_v55 = vpop.f32.mrb[36].mxu1 }
 0x260   : > { %1319 = vst [vmem:[%s2283_s17 + $0x10] sm:$0xff] %v1303_v7  ;;  %v1251_v11 = vadd.f32 %v1250_v55, %v1097_v8  ;;  %v1252_v12 = vpop.f32.mrb[37].mxu1  ;;  %v1299_v55 = vmul.f32 %v1654_v37, %v1233_v17 }
 0x261   : > { %1320 = vst [vmem:[%s2283_s17 + $0x18] sm:$0xff] %v1304_v9  ;;  %v1253_v14 = vadd.f32 %v1252_v12, %v1097_v8  ;;  %v1122_v8 = vpop.permute.xlu1 %1121 }
 0x262   : > { %v1305_v20 = vadd.f32 %v1289_v18, %v1251_v11  ;;  %v1655_v11 = vld [vmem:[%s1843_s20 + $0x78] sm:$0xff]  ;;  %s1656_s20 = scalar_lea.vmem %s2332_s19, 2048 }
 0x263   : > { %v1306_v56 = vadd.f32 %v1290_v15, %v1253_v14  ;;  %v1256_v22 = vpop.f32.mrb[38].mxu1  ;;  %v1300_v39 = vmul.f32 %v1655_v11, %v1235_v51  ;;  %p1657_p12 = scmp.ne.s32.totalorder %s2332_s19, %s1656_s20  ;;  %p1664_p2 = scmp.lt.s32.totalorder %s1662_s10, %s1656_s20 }
 0x264   : > { %1321 = vst [vmem:[%s2283_s17 + $0x20] sm:$0xff] %v1305_v20  ;;  %v1257_v25 = vadd.f32 %v1256_v22, %v1102_v21  ;;  %v1258_v24 = vpop.f32.mrb[39].mxu1 }
 0x265   : > { %1322 = vst [vmem:[%s2283_s17 + $0x28] sm:$0xff] %v1306_v56  ;;  %v1259_v28 = vadd.f32 %v1258_v24, %v1102_v21  ;;  %p1658_p13 = pnand %p1657_p12, %p1821_p4  ;;  %p1665_p3 = por %p1664_p2, %p1663_p1 }
 0x266   : > { %v1307_v49 = vadd.f32 %v1291_v48, %v1257_v25 }
 0x267   : > { %v1308_v30 = vadd.f32 %v1292_v57, %v1259_v28  ;;  %v1262_v58 = vpop.f32.mrb[40].mxu1  ;;  %p1659_p0 = pneg %p1658_p13 }
 0x268   : > { %1323 = vst [vmem:[%s2283_s17 + $0x30] sm:$0xff] %v1307_v49  ;;  %v1263_v38 = vadd.f32 %v1262_v58, %v1107_v29  ;;  %v1264_v60 = vpop.f32.mrb[41].mxu1 }
 0x269   : > { %1324 = vst [vmem:[%s2283_s17 + $0x38] sm:$0xff] %v1308_v30  ;;  %v1265_v32 = vadd.f32 %v1264_v60, %v1107_v29  ;;  %p1666_p5 = pnand %p1665_p3, %p1659_p0 }
 0x26a   : > { %v1309_v43 = vadd.f32 %v1293_v26, %v1263_v38 }
 0x26b   : > { %v1310_v44 = vadd.f32 %v1294_v42, %v1265_v32  ;;  %v1268_v35 = vpop.f32.mrb[42].mxu1 }
 0x26c   : > { %1325 = vst [vmem:[%s2283_s17 + $0x40] sm:$0xff] %v1309_v43  ;;  %v1269_v47 = vadd.f32 %v1268_v35, %v1112_v52  ;;  %v1270_v1 = vpop.f32.mrb[43].mxu1 }
 0x26d   : > { %1326 = vst [vmem:[%s2283_s17 + $0x48] sm:$0xff] %v1310_v44  ;;  %v1271_v59 = vadd.f32 %v1270_v1, %v1112_v52 }
 0x26e   : > { %v1311_v3 = vadd.f32 %v1295_v46, %v1269_v47 }
 0x26f   : > { %v1312_v62 = vadd.f32 %v1296_v2, %v1271_v59  ;;  %v1274_v63 = vpop.f32.mrb[44].mxu1 }
 0x270   : > { %1327 = vst [vmem:[%s2283_s17 + $0x50] sm:$0xff] %v1311_v3  ;;  %v1275_v5 = vadd.f32 %v1274_v63, %v1117_v4  ;;  %v1276_v13 = vpop.f32.mrb[45].mxu1 }
 0x271   : > { %1328 = vst [vmem:[%s2283_s17 + $0x58] sm:$0xff] %v1312_v62  ;;  %v1277_v54 = vadd.f32 %v1276_v13, %v1117_v4 }
 0x272   : > { %v1313_v7 = vadd.f32 %v1297_v34, %v1275_v5 }
 0x273   : > { %v1314_v45 = vadd.f32 %v1298_v36, %v1277_v54  ;;  %v1280_v9 = vpop.f32.mrb[46].mxu1 }
 0x274   : > { %1329 = vst [vmem:[%s2283_s17 + $0x60] sm:$0xff] %v1313_v7  ;;  %v1281_v18 = vadd.f32 %v1280_v9, %v1122_v8  ;;  %v1282_v10 = vpop.f32.mrb[47].mxu1 }
 0x275   : > { %1330 = vst [vmem:[%s2283_s17 + $0x68] sm:$0xff] %v1314_v45  ;;  %v1283_v40 = vadd.f32 %v1282_v10, %v1122_v8 }
 0x276   : > { %v1315_v12 = vadd.f32 %v1299_v55, %v1281_v18 }
 0x277   : > { %v1316_v15 = vadd.f32 %v1300_v39, %v1283_v40 }
 0x278   : > { %1331 = vst [vmem:[%s2283_s17 + $0x70] sm:$0xff] %v1315_v12 }
 0x279   : > { %1332 = vst [vmem:[%s2283_s17 + $0x78] sm:$0xff] %v1316_v15 }
 0x27a   : > { %1669 = shalt.err (!%p1666_p5)
}
 0x27b   : > { %s1670_s12 = scalar_lea.hbm %s2330_s23, 2048  ;;  %s1674_s17 = scalar_lea.hbm %s2391_s7, 4096 }
 0x27c   : > { %p1671_p6 = scmp.ne.s32.totalorder %s2330_s23, %s1670_s12  ;;  %p1675_p10 = scmp.lt.u32.totalorder %s2330_s23, %s2391_s7 }
 0x27d   : > { %p1676_p11 = scmp.lt.u32.totalorder %s1674_s17, %s1670_s12  ;;  %p1678_p13 = scmp.lt.u32.totalorder %s1670_s12, %s2330_s23 }
 0x27e   : > { %p1672_p7 = pnand %p1671_p6, %p1821_p4 }
 0x27f   : > { %p1677_p12 = por %p1676_p11, %p1675_p10 }
 0x280   : > { %p1673_p9 = pneg %p1672_p7 }
 0x281   : > { %p1679_p0 = por %p1678_p13, %p1677_p12 }
 0x283   : > { %p1680_p1 = pnand %p1679_p0, %p1673_p9 }
 0x285   : > { %1683 = shalt.err (!%p1680_p1)
}
 0x286   : > { %s1739_s22 = smov 256   ;;  %s1740_s20 = smov 16  }
 0x287   : > { %1588 = dma.vmem_to_hbm [thread:$0]  (%p1821_p4), %s2332_s19, 2048, %s2330_s23, %s2338_s27, %s1739_s22, %s1739_s22, %s1740_s20  }
 0x288 PF: > { %p1594_p2 = scmp.ge.s32.totalorder %s1734_s29, 2  ;;  %s1364_s30 = sand.u32 1, %s1714_s24  }
 0x289   : > { %s1365_s8 = scalar_lea.sflag [#allocation3], %s1364_s30 }
 0x28a   : > { %p1591_p3 = pnand %p1594_p2, %p1828_p8 }
 0x28c   : > { %1709 = dma.done.wait (!%p1591_p3), %s1365_s8, 2048  }
 0x28d   : > { %1711 = vsyncadd (!%p1591_p3), %s1365_s8, 4294965248  ;;  %s20_s29 = sadd.s32 1, %s1734_s29   ;;  %s2394_s24 = smov %s1718_s25 }
 0x28e   : > { %p17_p5 = scmp.ge.s32.totalorder %s20_s29, 4   ;;  %s2395_s25 = smov %s1722_s26 }
 0x28f   : > { %s2396_s26 = smov %s1834_s14  ;;  %s2397_s27 = smov %s1730_s28 }
 0x290   : > { %s2398_s28 = smov %s2400_s9  ;;  %19 = sbr.rel (!%p17_p5) target bundleno = 4 (0x4), region = 86 }
 0x297   :  { %1370 = vsyncpa [#allocation3], 1 }
 0x298   :  { %1372 = vsyncpa [#allocation3 + $0x1], 1 }

</bundles_post_ra>
